<compile_context>
chip_gen: v6e
topology: v6e:2x2x1
jax: 0.10.0
libtpu: 0.0.40
codegen_flags: <defaults>
</compile_context>

<pallas_src>
import jax
import jax.numpy as jnp
from jax import lax
from jax.experimental import pallas as pl
from jax.experimental.pallas import tpu as pltpu


# ----------------------------- banded weights -------------------------------
def _conv3x3_banded(w_hwio, width):
  """(3,3,C,D) HWIO -> (3, width*C, width*D) banded matrices (one per ky).

  B[ky][wi*C + ci, wo*D + do] = w[ky, wi - wo + 1, ci, do] when the kx tap is
  in range, else 0.  The W-direction zero padding (padding=1) is folded into
  the band clipping, so no padded slab is ever materialized.
  """
  kh, kw, c, d = w_hwio.shape
  wi = jnp.arange(width)[:, None]
  wo = jnp.arange(width)[None, :]
  kx = wi - wo + 1
  valid = ((kx >= 0) & (kx < kw)).astype(w_hwio.dtype)
  kx_c = jnp.clip(kx, 0, kw - 1)
  blocks = w_hwio[:, kx_c, :, :] * valid[None, :, :, None, None]  # (kh,W,W,C,D)
  return jnp.transpose(blocks, (0, 1, 3, 2, 4)).reshape(kh, width * c, width * d)


def _upconv2x2_banded(wt, win):
  """wt (2,2,Cin,Cout) indexed [di,dj,ci,co] -> U (2, win*Cin, 2*win*Cout).

  U[di][j*Cin + ci, wout*Cout + co] = wt[di, wout - 2j, ci, co] when
  wout in {2j, 2j+1}, else 0.  Output rows of parity di use U[di].
  """
  _, _, c, d = wt.shape
  wout_n = 2 * win
  j = jnp.arange(win)[:, None]
  wo = jnp.arange(wout_n)[None, :]
  dj = wo - 2 * j
  valid = ((dj >= 0) & (dj < 2)).astype(wt.dtype)
  dj_c = jnp.clip(dj, 0, 1)
  blocks = wt[:, dj_c, :, :] * valid[None, :, :, None, None]  # (2,win,wout,C,D)
  return jnp.transpose(blocks, (0, 1, 3, 2, 4)).reshape(2, win * c, wout_n * d)


# --------------------------------- kernel -----------------------------------
def _up_block_kernel(x2_ref, sk_ref, u_ref, ub_ref,
                     w1_ref, s1_ref, t1_ref,
                     w2_ref, s2_ref, t2_ref, y_ref):
  """One image per grid step. All refs are lane-dense (rows, W*C) slabs.

  x2_ref : (1, H, Win*Cin_t)            bf16  input rows pre-repeated (row r = r//2)
  sk_ref : (1, H, W*Csk)                bf16  skip connection slab
  u_ref  : (2, Win*Cin_t, W*Cup)        bf16  banded ConvTranspose weights (per parity)
  ub_ref : (1, W*Cup)                   f32   up bias tiled along W
  w1_ref : (3*(W*Cup + W*Csk), W*Cmid)  bf16  conv1 banded weights, row-stacked
                                              [ky=0: up|skip, ky=1: up|skip, ky=2: ...]
  s1/t1  : (1, W*Cmid)                  f32   folded BN1 scale / shift (tiled along W)
  w2_ref : (3*W*Cmid, W*Cout)           bf16  conv2 banded weights, row-stacked per ky
  s2/t2  : (1, W*Cout)                  f32
  y_ref  : (1, H, W*Cout)               f32
  """
  f32, bf16 = jnp.float32, jnp.bfloat16
  _, h_out, wcout = y_ref.shape

  # ---- ConvTranspose2d(kernel=2, stride=2): even rows use U[0], odd U[1].
  x2 = x2_ref[0]                                            # (H, Win*Cin_t)
  pe = jnp.dot(x2, u_ref[0], preferred_element_type=f32)
  po = jnp.dot(x2, u_ref[1], preferred_element_type=f32)
  row = lax.broadcasted_iota(jnp.int32, pe.shape, 0)
  up = jnp.where((row & 1) == 0, pe, po) + ub_ref[...]      # (H, W*Cup) f32

  # One-row shifts implement the H-direction zero padding of the 3x3 conv.
  def shift_down(t):          # row h <- t[h-1], row 0 <- 0
    zero = jnp.zeros((1, t.shape[1]), t.dtype)
    return jnp.concatenate([zero, t[:-1, :]], axis=0)

  def shift_up(t):            # row h <- t[h+1], last row <- 0
    zero = jnp.zeros((1, t.shape[1]), t.dtype)
    return jnp.concatenate([t[1:, :], zero], axis=0)

  def conv3x3_bn_relu(x_bf, w_ref, scale, shift):
    # Fold the three kernel-row taps into the contraction dim: one MXU matmul.
    x3 = jnp.concatenate([shift_down(x_bf), x_bf, shift_up(x_bf)], axis=1)
    c = jnp.dot(x3, w_ref[...], preferred_element_type=f32)
    return jnp.maximum(c * scale + shift, 0.0)

  # concat([up, skip]) is a 128-aligned lane concat (block layout matches the
  # row order of w1_ref), never a per-pixel channel interleave.
  cat0 = jnp.concatenate([up.astype(bf16), sk_ref[0]], axis=1)
  mid = conv3x3_bn_relu(cat0, w1_ref, s1_ref[...], t1_ref[...])   # (H, W*Cmid)
  y = conv3x3_bn_relu(mid.astype(bf16), w2_ref, s2_ref[...], t2_ref[...])

  y_ref[...] = y.reshape(1, h_out, wcout)


# -------------------------------- wrapper -----------------------------------
def up_block(inputs_nchw, skipped_nchw, wt, bt,
             w1_hwio, scale1, shift1, w2_hwio, scale2, shift2):
  """Pallas UpBlock. Inputs/outputs are NCHW to mirror PyTorch.

  wt is indexed [di, dj, ci, co] (PyTorch ConvTranspose2d weight permuted from
  (ci, co, di, dj)); scale*/shift* are the eval-mode folded conv-bias+BN terms.
  """
  n, cin_t, hin, win = inputs_nchw.shape
  _, csk, h, w = skipped_nchw.shape
  cup = wt.shape[-1]
  cmid = w1_hwio.shape[-1]
  cout = w2_hwio.shape[-1]
  assert h == 2 * hin and w == 2 * win
  assert w1_hwio.shape[2] == cup + csk

  bf16, f32 = jnp.bfloat16, jnp.float32

  # NCHW -> lane-dense (rows, W*C) slabs; bf16 MXU operands.
  x_slab = jnp.transpose(inputs_nchw, (0, 2, 3, 1)).reshape(n, hin, win * cin_t)
  x2_slab = jnp.repeat(x_slab, 2, axis=1).astype(bf16)        # row r -> in row r//2
  sk_slab = (jnp.transpose(skipped_nchw, (0, 2, 3, 1))
             .reshape(n, h, w * csk).astype(bf16))

  u = _upconv2x2_banded(wt.astype(f32), win).astype(bf16)
  ub = jnp.tile(bt.astype(f32), w).reshape(1, w * cup)

  # conv1 acts on concat([up, skip]); split the weight along input channels and
  # row-stack per kernel row so one matmul handles all taps and both halves.
  b1u = _conv3x3_banded(w1_hwio[:, :, :cup, :].astype(f32), w)   # (3, W*Cup, W*Cmid)
  b1s = _conv3x3_banded(w1_hwio[:, :, cup:, :].astype(f32), w)   # (3, W*Csk, W*Cmid)
  w1cat = (jnp.concatenate([b1u, b1s], axis=1)                   # (3, W*(Cup+Csk), W*Cmid)
           .reshape(3 * (w * cup + w * csk), w * cmid).astype(bf16))
  b2 = _conv3x3_banded(w2_hwio.astype(f32), w)                   # (3, W*Cmid, W*Cout)
  w2cat = b2.reshape(3 * w * cmid, w * cout).astype(bf16)

  s1 = jnp.tile(scale1.astype(f32), w).reshape(1, w * cmid)
  t1 = jnp.tile(shift1.astype(f32), w).reshape(1, w * cmid)
  s2 = jnp.tile(scale2.astype(f32), w).reshape(1, w * cout)
  t2 = jnp.tile(shift2.astype(f32), w).reshape(1, w * cout)

  y_slab = pl.pallas_call(
      _up_block_kernel,
      out_shape=jax.ShapeDtypeStruct((n, h, w * cout), f32),
      grid=(n,),
      in_specs=[
          pl.BlockSpec((1, h, win * cin_t), lambda i: (i, 0, 0)),
          pl.BlockSpec((1, h, w * csk), lambda i: (i, 0, 0)),
          pl.BlockSpec((2, win * cin_t, w * cup), lambda i: (0, 0, 0)),
          pl.BlockSpec((1, w * cup), lambda i: (0, 0)),
          pl.BlockSpec((3 * (w * cup + w * csk), w * cmid), lambda i: (0, 0)),
          pl.BlockSpec((1, w * cmid), lambda i: (0, 0)),
          pl.BlockSpec((1, w * cmid), lambda i: (0, 0)),
          pl.BlockSpec((3 * w * cmid, w * cout), lambda i: (0, 0)),
          pl.BlockSpec((1, w * cout), lambda i: (0, 0)),
          pl.BlockSpec((1, w * cout), lambda i: (0, 0)),
      ],
      out_specs=pl.BlockSpec((1, h, w * cout), lambda i: (i, 0, 0)),
      compiler_params=pltpu.CompilerParams(dimension_semantics=("parallel",)),
  )(x2_slab, sk_slab, u, ub, w1cat, s1, t1, w2cat, s2, t2)

  y = y_slab.reshape(n, h, w, cout)
  return jnp.transpose(y, (0, 3, 1, 2))                      # NHWC -> NCHW


# ------------------------- pure-JAX reference --------------------------------
def _ref_up_block(inputs, skipped, params):
  """Reference with standard XLA ops; same numerics policy (bf16 operands,
  f32 accumulation) so the comparison isolates kernel/layout bugs."""
  (wt, bt, w1, cb1, g1, be1, m1, v1, w2, cb2, g2, be2, m2, v2) = params
  eps = 1e-5
  bf16, f32 = jnp.bfloat16, jnp.float32

  x = jnp.transpose(inputs, (0, 2, 3, 1))                    # (N,Hin,Win,Cin_t)
  sk = jnp.transpose(skipped, (0, 2, 3, 1))                  # (N,H,W,Csk)
  n, hin, win, _ = x.shape
  cup = wt.shape[-1]

  # ConvTranspose2d(k=2, s=2): each input pixel expands to a 2x2 output block.
  up = jnp.einsum("nhwc,pqcd->nhpwqd", x.astype(bf16), wt.astype(bf16),
                  preferred_element_type=f32)
  up = up.reshape(n, 2 * hin, 2 * win, cup) + bt
  cat = jnp.concatenate([up, sk], axis=-1)

  def conv_bn_relu(inp, wc, cb, g, be, m, v):
    c = lax.conv_general_dilated(
        inp.astype(bf16), wc.astype(bf16), (1, 1), "SAME",
        dimension_numbers=("NHWC", "HWIO", "NHWC"),
        preferred_element_type=f32) + cb
    return jnp.maximum(g * (c - m) / jnp.sqrt(v + eps) + be, 0.0)

  hmid = conv_bn_relu(cat, w1, cb1, g1, be1, m1, v1)
  y = conv_bn_relu(hmid, w2, cb2, g2, be2, m2, v2)
  return jnp.transpose(y, (0, 3, 1, 2))


if __name__ == "__main__":
  # UpBlock(in_c=16, out_c=8): inputs (2,16,8,8), skip (2,8,16,16) -> (2,8,16,16)
  n = 2
  in_c, out_c = 16, 8
  skip_c = in_c - out_c            # concat channels must equal in_c
  hin = win = 8
  h, w = 2 * hin, 2 * win
  eps = 1e-5

  key = jax.random.PRNGKey(0)
  ks = jax.random.split(key, 16)
  inputs = jax.random.normal(ks[0], (n, in_c, hin, win), jnp.float32)
  skipped = jax.random.normal(ks[1], (n, skip_c, h, w), jnp.float32)

  # ConvTranspose2d(in_c, out_c, 2, stride=2) params; wt indexed [di,dj,ci,co].
  wt = jax.random.normal(ks[2], (2, 2, in_c, out_c), jnp.float32) * 0.2
  bt = jax.random.normal(ks[3], (out_c,), jnp.float32) * 0.1

  # ConvolutionalBlock(in_c, out_c): two 3x3 convs (HWIO) + eval-mode BN stats.
  w1 = jax.random.normal(ks[4], (3, 3, in_c, out_c), jnp.float32) * 0.2
  cb1 = jax.random.normal(ks[5], (out_c,), jnp.float32) * 0.1
  g1 = 1.0 + 0.1 * jax.random.normal(ks[6], (out_c,), jnp.float32)
  be1 = 0.1 * jax.random.normal(ks[7], (out_c,), jnp.float32)
  m1 = 0.1 * jax.random.normal(ks[8], (out_c,), jnp.float32)
  v1 = 0.5 + jnp.abs(jax.random.normal(ks[9], (out_c,), jnp.float32)) * 0.5

  w2 = jax.random.normal(ks[10], (3, 3, out_c, out_c), jnp.float32) * 0.2
  cb2 = jax.random.normal(ks[11], (out_c,), jnp.float32) * 0.1
  g2 = 1.0 + 0.1 * jax.random.normal(ks[12], (out_c,), jnp.float32)
  be2 = 0.1 * jax.random.normal(ks[13], (out_c,), jnp.float32)
  m2 = 0.1 * jax.random.normal(ks[14], (out_c,), jnp.float32)
  v2 = 0.5 + jnp.abs(jax.random.normal(ks[15], (out_c,), jnp.float32)) * 0.5

  # Fold conv bias + eval-mode BN into per-channel scale/shift for the kernel.
  scale1 = g1 / jnp.sqrt(v1 + eps)
  shift1 = scale1 * (cb1 - m1) + be1
  scale2 = g2 / jnp.sqrt(v2 + eps)
  shift2 = scale2 * (cb2 - m2) + be2

  y_k = up_block(inputs, skipped, wt, bt, w1, scale1, shift1, w2, scale2, shift2)
  y_k = jax.block_until_ready(y_k)

  y_r = _ref_up_block(
      inputs, skipped,
      (wt, bt, w1, cb1, g1, be1, m1, v1, w2, cb2, g2, be2, m2, v2))

  assert y_k.shape == (n, out_c, h, w)
  # Tolerance covers bf16-operand rounding / summation-order differences only;
  # both kernel and reference use bf16 operands with f32 accumulation.
  err = float(jnp.max(jnp.abs(y_k - y_r)))
  assert jnp.allclose(y_k, y_r, atol=5e-3, rtol=5e-3), err

  print("KERNEL_OK")
</pallas_src>

<mosaic_0001>
module attributes {stable_mosaic.version = 11 : i64} {
  func.func @_up_block_kernel(%arg0: i32, %arg1: memref<1x16x128xbf16, #tpu.memory_space<vmem>>, %arg2: memref<1x16x128xbf16, #tpu.memory_space<vmem>>, %arg3: memref<2x128x128xbf16, #tpu.memory_space<vmem>>, %arg4: memref<1x128xf32, #tpu.memory_space<vmem>>, %arg5: memref<768x128xbf16, #tpu.memory_space<vmem>>, %arg6: memref<1x128xf32, #tpu.memory_space<vmem>>, %arg7: memref<1x128xf32, #tpu.memory_space<vmem>>, %arg8: memref<384x128xbf16, #tpu.memory_space<vmem>>, %arg9: memref<1x128xf32, #tpu.memory_space<vmem>>, %arg10: memref<1x128xf32, #tpu.memory_space<vmem>>, %arg11: memref<1x16x128xf32, #tpu.memory_space<vmem>>) attributes {dimension_semantics = [#tpu.dimension_semantics<parallel>], iteration_bounds = array<i64: 2>, scalar_prefetch = 0 : i64, scratch_operands = 0 : i64, tpu.core_type = #tpu.core_type<tc>, window_params = [{transform_indices = @transform_0, window_bounds = array<i64: 1, 16, 128>}, {transform_indices = @transform_1, window_bounds = array<i64: 1, 16, 128>}, {pipeline_mode = #tpu.pipeline_mode<synchronous>, transform_indices = @transform_2, window_bounds = array<i64: 2, 128, 128>}, {pipeline_mode = #tpu.pipeline_mode<synchronous>, transform_indices = @transform_3, window_bounds = array<i64: 1, 128>}, {pipeline_mode = #tpu.pipeline_mode<synchronous>, transform_indices = @transform_4, window_bounds = array<i64: 768, 128>}, {pipeline_mode = #tpu.pipeline_mode<synchronous>, transform_indices = @transform_5, window_bounds = array<i64: 1, 128>}, {pipeline_mode = #tpu.pipeline_mode<synchronous>, transform_indices = @transform_6, window_bounds = array<i64: 1, 128>}, {pipeline_mode = #tpu.pipeline_mode<synchronous>, transform_indices = @transform_7, window_bounds = array<i64: 384, 128>}, {pipeline_mode = #tpu.pipeline_mode<synchronous>, transform_indices = @transform_8, window_bounds = array<i64: 1, 128>}, {pipeline_mode = #tpu.pipeline_mode<synchronous>, transform_indices = @transform_9, window_bounds = array<i64: 1, 128>}, {transform_indices = @transform_10, window_bounds = array<i64: 1, 16, 128>}]} {
    %c0 = arith.constant 0 : index
    %c0_0 = arith.constant 0 : index
    %c0_1 = arith.constant 0 : index
    %0 = vector.load %arg1[%c0, %c0_0, %c0_1] : memref<1x16x128xbf16, #tpu.memory_space<vmem>>, vector<1x16x128xbf16>
    %1 = vector.shape_cast %0 : vector<1x16x128xbf16> to vector<16x128xbf16>
    %c0_2 = arith.constant 0 : index
    %c0_3 = arith.constant 0 : index
    %c0_4 = arith.constant 0 : index
    %2 = vector.load %arg3[%c0_2, %c0_3, %c0_4] : memref<2x128x128xbf16, #tpu.memory_space<vmem>>, vector<1x128x128xbf16>
    %3 = vector.shape_cast %2 : vector<1x128x128xbf16> to vector<128x128xbf16>
    %cst = arith.constant dense<0.000000e+00> : vector<16x128xf32>
    %4 = tpu.matmul %1, %3, %cst {dimension_numbers = #tpu.dot_dimension_numbers<[1], [0], [0], [1], [0, 0, 1, 1], [], []>} : vector<16x128xbf16>, vector<128x128xbf16>, vector<16x128xf32> -> vector<16x128xf32>
    %c1 = arith.constant 1 : index
    %c0_5 = arith.constant 0 : index
    %c0_6 = arith.constant 0 : index
    %5 = vector.load %arg3[%c1, %c0_5, %c0_6] : memref<2x128x128xbf16, #tpu.memory_space<vmem>>, vector<1x128x128xbf16>
    %6 = vector.shape_cast %5 : vector<1x128x128xbf16> to vector<128x128xbf16>
    %cst_7 = arith.constant dense<0.000000e+00> : vector<16x128xf32>
    %7 = tpu.matmul %1, %6, %cst_7 {dimension_numbers = #tpu.dot_dimension_numbers<[1], [0], [0], [1], [0, 0, 1, 1], [], []>} : vector<16x128xbf16>, vector<128x128xbf16>, vector<16x128xf32> -> vector<16x128xf32>
    %8 = tpu.iota {dimensions = array<i32: 0>} : vector<16x128xi32>
    %c1_i32 = arith.constant 1 : i32
    %9 = vector.broadcast %c1_i32 : i32 to vector<16x128xi32>
    %10 = arith.andi %8, %9 : vector<16x128xi32>
    %c0_i32 = arith.constant 0 : i32
    %11 = vector.broadcast %c0_i32 : i32 to vector<16x128xi32>
    %12 = arith.cmpi eq, %10, %11 : vector<16x128xi32>
    %13 = arith.select %12, %4, %7 : vector<16x128xi1>, vector<16x128xf32>
    %c0_8 = arith.constant 0 : index
    %c0_9 = arith.constant 0 : index
    %14 = vector.load %arg4[%c0_8, %c0_9] : memref<1x128xf32, #tpu.memory_space<vmem>>, vector<1x128xf32>
    %15 = vector.broadcast %14 : vector<1x128xf32> to vector<16x128xf32>
    %16 = arith.addf %13, %15 : vector<16x128xf32>
    %17 = arith.truncf %16 : vector<16x128xf32> to vector<16x128xbf16>
    %c0_10 = arith.constant 0 : index
    %c0_11 = arith.constant 0 : index
    %c0_12 = arith.constant 0 : index
    %18 = vector.load %arg2[%c0_10, %c0_11, %c0_12] : memref<1x16x128xbf16, #tpu.memory_space<vmem>>, vector<1x16x128xbf16>
    %19 = vector.shape_cast %18 : vector<1x16x128xbf16> to vector<16x128xbf16>
    %20 = tpu.concatenate %17, %19 in 1 : vector<16x128xbf16>, vector<16x128xbf16> -> vector<16x256xbf16>
    %c0_13 = arith.constant 0 : index
    %c0_14 = arith.constant 0 : index
    %21 = vector.load %arg6[%c0_13, %c0_14] : memref<1x128xf32, #tpu.memory_space<vmem>>, vector<1x128xf32>
    %c0_15 = arith.constant 0 : index
    %c0_16 = arith.constant 0 : index
    %22 = vector.load %arg7[%c0_15, %c0_16] : memref<1x128xf32, #tpu.memory_space<vmem>>, vector<1x128xf32>
    %cst_17 = arith.constant 0.000000e+00 : bf16
    %23 = vector.broadcast %cst_17 : bf16 to vector<1x256xbf16>
    %24 = vector.extract_strided_slice %20 {offsets = [0, 0], sizes = [15, 256], strides = [1, 1]} : vector<16x256xbf16> to vector<15x256xbf16>
    %25 = tpu.concatenate %23, %24 in 0 : vector<1x256xbf16>, vector<15x256xbf16> -> vector<16x256xbf16>
    %cst_18 = arith.constant 0.000000e+00 : bf16
    %26 = vector.broadcast %cst_18 : bf16 to vector<1x256xbf16>
    %27 = vector.extract_strided_slice %20 {offsets = [1, 0], sizes = [15, 256], strides = [1, 1]} : vector<16x256xbf16> to vector<15x256xbf16>
    %28 = tpu.concatenate %27, %26 in 0 : vector<15x256xbf16>, vector<1x256xbf16> -> vector<16x256xbf16>
    %29 = tpu.concatenate %25, %20, %28 in 1 : vector<16x256xbf16>, vector<16x256xbf16>, vector<16x256xbf16> -> vector<16x768xbf16>
    %c0_19 = arith.constant 0 : index
    %c0_20 = arith.constant 0 : index
    %30 = vector.load %arg5[%c0_19, %c0_20] : memref<768x128xbf16, #tpu.memory_space<vmem>>, vector<768x128xbf16>
    %cst_21 = arith.constant dense<0.000000e+00> : vector<16x128xf32>
    %31 = tpu.matmul %29, %30, %cst_21 {dimension_numbers = #tpu.dot_dimension_numbers<[1], [0], [0], [1], [0, 0, 1, 1], [], []>} : vector<16x768xbf16>, vector<768x128xbf16>, vector<16x128xf32> -> vector<16x128xf32>
    %32 = vector.broadcast %21 : vector<1x128xf32> to vector<16x128xf32>
    %33 = arith.mulf %31, %32 : vector<16x128xf32>
    %34 = vector.broadcast %22 : vector<1x128xf32> to vector<16x128xf32>
    %35 = arith.addf %33, %34 : vector<16x128xf32>
    %cst_22 = arith.constant 0.000000e+00 : f32
    %36 = vector.broadcast %cst_22 : f32 to vector<16x128xf32>
    %37 = arith.maximumf %35, %36 : vector<16x128xf32>
    %38 = arith.truncf %37 : vector<16x128xf32> to vector<16x128xbf16>
    %c0_23 = arith.constant 0 : index
    %c0_24 = arith.constant 0 : index
    %39 = vector.load %arg9[%c0_23, %c0_24] : memref<1x128xf32, #tpu.memory_space<vmem>>, vector<1x128xf32>
    %c0_25 = arith.constant 0 : index
    %c0_26 = arith.constant 0 : index
    %40 = vector.load %arg10[%c0_25, %c0_26] : memref<1x128xf32, #tpu.memory_space<vmem>>, vector<1x128xf32>
    %cst_27 = arith.constant 0.000000e+00 : bf16
    %41 = vector.broadcast %cst_27 : bf16 to vector<1x128xbf16>
    %42 = vector.extract_strided_slice %38 {offsets = [0, 0], sizes = [15, 128], strides = [1, 1]} : vector<16x128xbf16> to vector<15x128xbf16>
    %43 = tpu.concatenate %41, %42 in 0 : vector<1x128xbf16>, vector<15x128xbf16> -> vector<16x128xbf16>
    %cst_28 = arith.constant 0.000000e+00 : bf16
    %44 = vector.broadcast %cst_28 : bf16 to vector<1x128xbf16>
    %45 = vector.extract_strided_slice %38 {offsets = [1, 0], sizes = [15, 128], strides = [1, 1]} : vector<16x128xbf16> to vector<15x128xbf16>
    %46 = tpu.concatenate %45, %44 in 0 : vector<15x128xbf16>, vector<1x128xbf16> -> vector<16x128xbf16>
    %47 = tpu.concatenate %43, %38, %46 in 1 : vector<16x128xbf16>, vector<16x128xbf16>, vector<16x128xbf16> -> vector<16x384xbf16>
    %c0_29 = arith.constant 0 : index
    %c0_30 = arith.constant 0 : index
    %48 = vector.load %arg8[%c0_29, %c0_30] : memref<384x128xbf16, #tpu.memory_space<vmem>>, vector<384x128xbf16>
    %cst_31 = arith.constant dense<0.000000e+00> : vector<16x128xf32>
    %49 = tpu.matmul %47, %48, %cst_31 {dimension_numbers = #tpu.dot_dimension_numbers<[1], [0], [0], [1], [0, 0, 1, 1], [], []>} : vector<16x384xbf16>, vector<384x128xbf16>, vector<16x128xf32> -> vector<16x128xf32>
    %50 = vector.broadcast %39 : vector<1x128xf32> to vector<16x128xf32>
    %51 = arith.mulf %49, %50 : vector<16x128xf32>
    %52 = vector.broadcast %40 : vector<1x128xf32> to vector<16x128xf32>
    %53 = arith.addf %51, %52 : vector<16x128xf32>
    %cst_32 = arith.constant 0.000000e+00 : f32
    %54 = vector.broadcast %cst_32 : f32 to vector<16x128xf32>
    %55 = arith.maximumf %53, %54 : vector<16x128xf32>
    %56 = vector.shape_cast %55 : vector<16x128xf32> to vector<1x16x128xf32>
    %c0_33 = arith.constant 0 : index
    %c0_34 = arith.constant 0 : index
    %c0_35 = arith.constant 0 : index
    %57 = vector.load %arg11[%c0_33, %c0_34, %c0_35] : memref<1x16x128xf32, #tpu.memory_space<vmem>>, vector<1x16x128xf32>
    tpu.vector_store %arg11[%c0_33, %c0_34, %c0_35], %56 {strides = array<i32>} : memref<1x16x128xf32, #tpu.memory_space<vmem>>, vector<1x16x128xf32>,
    return
  }
  func.func @transform_0(%arg0: i32) -> (i32, i32, i32) {
    %c0_i32 = arith.constant 0 : i32
    %c0_i32_0 = arith.constant 0 : i32
    %c0_i32_1 = arith.constant 0 : i32
    return %arg0, %c0_i32, %c0_i32_0 : i32, i32, i32
  }
  func.func @transform_1(%arg0: i32) -> (i32, i32, i32) {
    %c0_i32 = arith.constant 0 : i32
    %c0_i32_0 = arith.constant 0 : i32
    %c0_i32_1 = arith.constant 0 : i32
    return %arg0, %c0_i32, %c0_i32_0 : i32, i32, i32
  }
  func.func @transform_2(%arg0: i32) -> (i32, i32, i32) {
    %c0_i32 = arith.constant 0 : i32
    %c0_i32_0 = arith.constant 0 : i32
    %c0_i32_1 = arith.constant 0 : i32
    %c0_i32_2 = arith.constant 0 : i32
    return %c0_i32, %c0_i32_0, %c0_i32_1 : i32, i32, i32
  }
  func.func @transform_3(%arg0: i32) -> (i32, i32) {
    %c0_i32 = arith.constant 0 : i32
    %c0_i32_0 = arith.constant 0 : i32
    %c0_i32_1 = arith.constant 0 : i32
    return %c0_i32, %c0_i32_0 : i32, i32
  }
  func.func @transform_4(%arg0: i32) -> (i32, i32) {
    %c0_i32 = arith.constant 0 : i32
    %c0_i32_0 = arith.constant 0 : i32
    %c0_i32_1 = arith.constant 0 : i32
    return %c0_i32, %c0_i32_0 : i32, i32
  }
  func.func @transform_5(%arg0: i32) -> (i32, i32) {
    %c0_i32 = arith.constant 0 : i32
    %c0_i32_0 = arith.constant 0 : i32
    %c0_i32_1 = arith.constant 0 : i32
    return %c0_i32, %c0_i32_0 : i32, i32
  }
  func.func @transform_6(%arg0: i32) -> (i32, i32) {
    %c0_i32 = arith.constant 0 : i32
    %c0_i32_0 = arith.constant 0 : i32
    %c0_i32_1 = arith.constant 0 : i32
    return %c0_i32, %c0_i32_0 : i32, i32
  }
  func.func @transform_7(%arg0: i32) -> (i32, i32) {
    %c0_i32 = arith.constant 0 : i32
    %c0_i32_0 = arith.constant 0 : i32
    %c0_i32_1 = arith.constant 0 : i32
    return %c0_i32, %c0_i32_0 : i32, i32
  }
  func.func @transform_8(%arg0: i32) -> (i32, i32) {
    %c0_i32 = arith.constant 0 : i32
    %c0_i32_0 = arith.constant 0 : i32
    %c0_i32_1 = arith.constant 0 : i32
    return %c0_i32, %c0_i32_0 : i32, i32
  }
  func.func @transform_9(%arg0: i32) -> (i32, i32) {
    %c0_i32 = arith.constant 0 : i32
    %c0_i32_0 = arith.constant 0 : i32
    %c0_i32_1 = arith.constant 0 : i32
    return %c0_i32, %c0_i32_0 : i32, i32
  }
  func.func @transform_10(%arg0: i32) -> (i32, i32, i32) {
    %c0_i32 = arith.constant 0 : i32
    %c0_i32_0 = arith.constant 0 : i32
    %c0_i32_1 = arith.constant 0 : i32
    return %arg0, %c0_i32, %c0_i32_0 : i32, i32, i32
  }
}

</mosaic_0001>

<bundles_post_ra>
// kernel: tpu_custom_call.1
= control target key start
LH: loop header
LB: loop body
LE: loop exit
PB: predicated region body
PF: predicated region fallthrough
CT: control target
= control target key end

     0   :  { %s2801_s0 = inlined_call_operand.hbm [shape: bf16[2,16,128], index: 0, kind: input, shape index: {}]   ;;  %s2802_s1 = inlined_call_operand.hbm [shape: bf16[2,16,128], index: 1, kind: input, shape index: {}]   ;;  %s2803_s2 = inlined_call_operand.hbm [shape: bf16[2,128,128], index: 2, kind: input, shape index: {}]   ;;  %s2804_s3 = inlined_call_operand.vmem [shape: f32[1,128], index: 3, kind: input, shape index: {}]   ;;  %s2805_s4 = inlined_call_operand.hbm [shape: bf16[768,128], index: 4, kind: input, shape index: {}]   ;;  %s2806_s5 = inlined_call_operand.vmem [shape: f32[1,128], index: 5, kind: input, shape index: {}]   ;;  %s2807_s6 = inlined_call_operand.vmem [shape: f32[1,128], index: 6, kind: input, shape index: {}]   ;;  %s2808_s7 = inlined_call_operand.hbm [shape: bf16[384,128], index: 7, kind: input, shape index: {}]   ;;  %s2809_s8 = inlined_call_operand.vmem [shape: f32[1,128], index: 8, kind: input, shape index: {}]   ;;  %s2810_s9 = inlined_call_operand.vmem [shape: f32[1,128], index: 9, kind: input, shape index: {}]   ;;  %s2811_s10 = inlined_call_operand.hbm [shape: f32[2,16,128], index: 10, kind: output, shape index: {}]  }
   0x1   :  { %2824 = sst [smem:[#allocation22_spill]] %s2801_s0 }
   0x2   :  { %2825 = sst [smem:[#allocation23_spill]] %s2803_s2 }
   0x3   :  { %2826 = sst [smem:[#allocation24_spill]] %s2805_s4 }
   0x4   :  { %2827 = sst [smem:[#allocation25_spill]] %s2808_s7 }
   0x5   :  { %15 = vsyncpa [#allocation3], 0 }
   0x6   :  { %17 = vsyncpa [#allocation3 + $0x1], 0 }
   0x7   :  { %18 = vsyncpa [#allocation6], 0 }
   0x8   :  { %20 = vsyncpa [#allocation6 + $0x1], 0 }
   0x9   :  { %21 = vsyncpa [#allocation9], 0 }
   0xa   :  { %22 = vsyncpa [#allocation4], 0 }
   0xb   :  { %24 = vsyncpa [#allocation4 + $0x1], 0  ;;  %s2469_s13 = smov 0   ;;  %s2471_s14 = smov 0  }
   0xc   :  { %s2473_s15 = smov 0   ;;  %s2475_s16 = smov 0  }
   0xd LB: > { %2828 = sst [smem:[#allocation17_spill]] %s2388_s13  ;;  %s2490_s17 = sadd.s32 4294967295, %s2400_s16   ;;  %s2400_s16 = sphi %s2475_s16, %s2859_s16   ;;  %s2396_s15 = sphi %s2473_s15, %s2861_s15   ;;  %s2392_s14 = sphi %s2471_s14, %s2863_s14   ;;  %s2388_s13 = sphi %s2469_s13, %s2862_s13  }
   0xe   : > { %2829 = sst [smem:[#allocation18_spill]] %s2396_s15  ;;  %s1715_s18 = sadd.s32 4294967294, %s2400_s16  }
   0xf   : > { %p50_p0 = scmp.ne.s32.totalorder %s2392_s14, %s2388_s13  ;;  %p2812_p1 = scmp.eq.s32.totalorder %s2490_s17, 0 }
  0x10   : > { %p268_p2 = scmp.eq.s32.totalorder %s2490_s17, 1  ;;  %p274_p3 = scmp.eq.s32.totalorder %s1715_s18, 1 }
  0x11   : > { %p2499_p4 = por %p2812_p1, %p50_p0  ;;  %p1716_p5 = scmp.ge.s32.totalorder %s2400_s16, 1 }
  0x12   : > { %p2504_p6 = por %p274_p3, %p50_p0  ;;  %p281_p7 = scmp.lt.s32.totalorder %s2400_s16, 3 }
  0x13   : > { %s2830_s19 = scalar_select %p2499_p4, 1, 0 }
  0x14   : > { %s2831_s20 = scalar_select %p2504_p6, 1, 0 }
  0x15   : > { %p2509_p8 = pnand %p1716_p5, %p281_p7  ;;  %s2402_s22 = smov [#allocation7]  }
  0x16   : > { %2832 = sst [smem:[#allocation19_spill]] %s2831_s20  ;;  %s293_s23 = sshll.u32 %s2402_s22, 4  ;;  %s294_s23 = int_to_ptr.vmem [resolvable:$true] %s293_s23 }
  0x17   : > { %p2030_p9 = pneg %p2509_p8  ;;  %s2403_s25 = smov [#allocation8]  }
  0x18   : > { %s309_s26 = sshll.u32 %s2403_s25, 4  ;;  %s2404_s27 = smov [#allocation10]   ;;  %s310_s26 = int_to_ptr.vmem [resolvable:$true] %s309_s26 }
  0x19   : > { %p2518_p11 = pnand %p2030_p9, %p2812_p1  ;;  %s328_s28 = sshll.u32 %s2404_s27, 4  ;;  %s329_s28 = int_to_ptr.vmem [resolvable:$true] %s328_s28 }
  0x1a   : > { %s2201_s29 = scalar_lea.vmem %s294_s23, 2048  ;;  %p2209_p5 = scmp.lt.s32.totalorder %s294_s23, %s294_s23 }
  0x1b   : > { %p2192_p12 = pneg %p2518_p11  ;;  %p2202_p13 = scmp.ne.s32.totalorder %s294_s23, %s2201_s29 }
  0x1c   : > { %p2210_p7 = scmp.lt.s32.totalorder %s2201_s29, %s2201_s29 }
  0x1d   : > { %p2204_p0 = pnand %p2202_p13, %p2192_p12 }
  0x1e   : > { %p2211_p9 = por %p2210_p7, %p2209_p5 }
  0x1f   : > { %p2205_p3 = pneg %p2204_p0 }
  0x21   : > { %p2212_p10 = pnand %p2211_p9, %p2205_p3 }
  0x23   : > { %2215 = shalt.err (!%p2212_p10)
}
  0x24   : > { %s2813_s30 = smov 64   ;;  %s2815_s11 = smov 4  }
  0x25   : > { %s2835_s2 = sld [smem:[#allocation23_spill]]  ;;  %s2227_s22 = scalar_lea.vmem %s310_s26, 6144 }
  0x26   : > { %p2228_p13 = scmp.ne.s32.totalorder %s310_s26, %s2227_s22  ;;  %p2235_p3 = scmp.lt.s32.totalorder %s310_s26, %s310_s26 }
  0x27   : > { %p2236_p10 = scmp.lt.s32.totalorder %s2227_s22, %s2227_s22 }
  0x28   : > { %p2230_p0 = pnand %p2228_p13, %p2192_p12 }
  0x29   : > { %p2237_p7 = por %p2236_p10, %p2235_p3 }
  0x2a   : > { %p2231_p5 = pneg %p2230_p0 }
  0x2b   : > { %2033 = dma.hbm_to_vmem [thread:$0]  (!%p2518_p11), %s2835_s2, 2048, %s294_s23, [#allocation6], %s2813_s30, %s2813_s30, %s2815_s11  }
  0x2c   : > { %p2238_p9 = pnand %p2237_p7, %p2231_p5 }
  0x2e   : > { %2241 = shalt.err (!%p2238_p9)
}
  0x2f   : > { %s2836_s4 = sld [smem:[#allocation24_spill]]  ;;  %s2253_s23 = scalar_lea.vmem %s329_s28, 3072 }
  0x30   : > { %p2254_p1 = scmp.ne.s32.totalorder %s329_s28, %s2253_s23  ;;  %p2261_p3 = scmp.lt.s32.totalorder %s329_s28, %s329_s28 }
  0x31   : > { %p2262_p5 = scmp.lt.s32.totalorder %s2253_s23, %s2253_s23 }
  0x32   : > { %p2256_p13 = pnand %p2254_p1, %p2192_p12 }
  0x33   : > { %p2263_p10 = por %p2262_p5, %p2261_p3 }
  0x34   : > { %p2257_p0 = pneg %p2256_p13 }
  0x35   : > { %2036 = dma.hbm_to_vmem [thread:$0]  (!%p2518_p11), %s2836_s4, 6144, %s310_s26, [#allocation9], %s2813_s30, %s2813_s30, %s2815_s11  }
  0x36   : > { %p2264_p7 = pnand %p2263_p10, %p2257_p0 }
  0x38   : > { %2267 = shalt.err (!%p2264_p7)
}
  0x39   : > { %s2837_s7 = sld [smem:[#allocation25_spill]]  ;;  %s2558_s26 = sadd.s32 1, %s2400_s16  }
  0x3a   : > { %2838 = sst [smem:[#allocation20_spill]] %s2558_s26  ;;  %s34_s24 = ssub.s32 %s2400_s16, %s2558_s26 }
  0x3b   : > { %s37_s18 = sadd.s32 1, %s2396_s15  ;;  %p35_p1 = scmp.eq.s32.totalorder %s34_s24, 0 }
  0x3c   : > { %p44_p12 = scmp.ne.s32.totalorder %s2396_s15, %s2392_s14  ;;  %p45_p9 = scmp.eq.s32.totalorder %s2400_s16, 0 }
  0x3d   : > { %p2054_p13 = scmp.lt.s32.totalorder %s2400_s16, 2  ;;  %s348_s27 = sand.u32 1, %s2396_s15  }
  0x3e   : > { %s2568_s22 = scalar_select %p35_p1, %s2396_s15, %s37_s18  }
  0x3f   : > { %2039 = dma.hbm_to_vmem [thread:$0]  (!%p2518_p11), %s2837_s7, 3072, %s329_s28, [#allocation9], %s2813_s30, %s2813_s30, %s2815_s11  }
  0x40   : > { %2839 = sst [smem:[#allocation21_spill]] %s2568_s22  ;;  %p46_p0 = por %p45_p9, %p44_p12 }
  0x41   : > { %p2572_p3 = por %p268_p2, %p44_p12  ;;  %s1834_s23 = sshll.u32 %s2400_s16, 7 }
  0x42   : > { %s2578_s28 = sshll.u32 %s348_s27, 3  ;;  %s2841_s0 = sld [smem:[#allocation22_spill]] }
  0x43   : > { %s2840_s25 = scalar_select %p2572_p3, 1, 0 }
  0x44   : > { %s352_s18 = scalar_lea.vmem [#allocation2], %s2578_s28  ;;  %p2586_p11 = pnand %p2054_p13, %p46_p0 }
  0x45   : > { %s359_s30 = sshll.u32 %s352_s18, 4  ;;  %s2595_s29 = scalar_lea.hbm %s2802_s1, %s1834_s23  ;;  %s2590_s30 = int_to_ptr.vmem [resolvable:$true] %s359_s30 }
  0x46   : > { %s2597_s12 = scalar_lea.sflag [#allocation3], %s348_s27  ;;  %p2270_p5 = pneg %p2586_p11 }
  0x48   : > { %s2583_s24 = scalar_lea.hbm %s2841_s0, %s1834_s23  ;;  %s2273_s15 = scalar_lea.hbm %s2841_s0, 256 }
  0x49   : > { %s2268_s7 = scalar_lea.hbm %s2583_s24, 128  ;;  %p2274_p1 = scmp.lt.s32.totalorder %s2583_s24, %s2841_s0 }
  0x4a   : > { %p2269_p2 = scmp.ne.s32.totalorder %s2583_s24, %s2268_s7  ;;  %p2275_p12 = scmp.lt.s32.totalorder %s2273_s15, %s2268_s7 }
  0x4c   : > { %p2271_p10 = pnand %p2270_p5, %p2269_p2  ;;  %p2276_p9 = por %p2275_p12, %p2274_p1 }
  0x4e   : > { %p2272_p7 = pneg %p2271_p10 }
  0x50   : > { %p2277_p13 = pnand %p2276_p9, %p2272_p7 }
  0x52   : > { %2280 = shalt.err (!%p2277_p13)
}
  0x53   : > { %s2281_s2 = scalar_lea.vmem %s2590_s30, 128  ;;  %s2407_s4 = smov [#allocation2]  }
  0x54   : > { %p2282_p0 = scmp.ne.s32.totalorder %s2590_s30, %s2281_s2  ;;  %s2286_s22 = sshll.u32 %s2407_s4, 4  ;;  %s2287_s22 = int_to_ptr.vmem [resolvable:$false] %s2286_s22 }
  0x55   : > { %s2288_s27 = scalar_lea.vmem %s2287_s22, 256  ;;  %p2289_p6 = scmp.lt.s32.totalorder %s2590_s30, %s2287_s22 }
  0x56   : > { %p2284_p2 = pnand %p2282_p0, %p2270_p5  ;;  %p2290_p3 = scmp.lt.s32.totalorder %s2288_s27, %s2281_s2 }
  0x58   : > { %p2285_p10 = pneg %p2284_p2  ;;  %p2291_p4 = por %p2290_p3, %p2289_p6 }
  0x5a   : > { %p2292_p1 = pnand %p2291_p4, %p2285_p10 }
  0x5c   : > { %2295 = shalt.err (!%p2292_p1)
}
  0x5d   : > { %s2843_s7 = smov 4   ;;  %s2844_s15 = smov 64  }
  0x5e   : > { %2043 = dma.hbm_to_vmem [thread:$0]  (!%p2586_p11), %s2583_s24, 128, %s2590_s30, %s2597_s12, %s2844_s15, %s2844_s15, %s2843_s7  }
  0x5f   : > { %s373_s20 = scalar_lea.vmem [#allocation5], %s2578_s28  ;;  %s369_s23 = sand.u32 1, %s2400_s16  }
  0x60   : > { %s380_s26 = sshll.u32 %s373_s20, 4  ;;  %s370_s18 = scalar_lea.sflag [#allocation6], %s369_s23  ;;  %s2629_s26 = int_to_ptr.vmem [resolvable:$true] %s380_s26 }
  0x61   : > { %s2296_s2 = scalar_lea.hbm %s2595_s29, 128  ;;  %s2301_s27 = scalar_lea.hbm %s2802_s1, 256 }
  0x62   : > { %p2297_p4 = scmp.ne.s32.totalorder %s2595_s29, %s2296_s2  ;;  %p2302_p7 = scmp.lt.s32.totalorder %s2595_s29, %s2802_s1 }
  0x63   : > { %p2303_p12 = scmp.lt.s32.totalorder %s2301_s27, %s2296_s2 }
  0x64   : > { %p2299_p6 = pnand %p2297_p4, %p2270_p5 }
  0x65   : > { %p2304_p9 = por %p2303_p12, %p2302_p7 }
  0x66   : > { %p2300_p3 = pneg %p2299_p6 }
  0x68   : > { %p2305_p13 = pnand %p2304_p9, %p2300_p3 }
  0x6a   : > { %2308 = shalt.err (!%p2305_p13)
}
  0x6b   : > { %s2309_s30 = scalar_lea.vmem %s2629_s26, 128  ;;  %s2408_s28 = smov [#allocation5]  }
  0x6c   : > { %p2310_p0 = scmp.ne.s32.totalorder %s2629_s26, %s2309_s30  ;;  %s2314_s24 = sshll.u32 %s2408_s28, 4  ;;  %s2315_s24 = int_to_ptr.vmem [resolvable:$false] %s2314_s24 }
  0x6d   : > { %s2316_s12 = scalar_lea.vmem %s2315_s24, 256  ;;  %p2317_p1 = scmp.lt.s32.totalorder %s2629_s26, %s2315_s24 }
  0x6e   : > { %p2312_p2 = pnand %p2310_p0, %p2270_p5  ;;  %p2318_p4 = scmp.lt.s32.totalorder %s2316_s12, %s2309_s30 }
  0x70   : > { %p2313_p10 = pneg %p2312_p2  ;;  %p2319_p6 = por %p2318_p4, %p2317_p1 }
  0x72   : > { %p2320_p7 = pnand %p2319_p6, %p2313_p10 }
  0x74   : > { %2323 = shalt.err (!%p2320_p7)
}
  0x75   : > { %2046 = dma.hbm_to_vmem [thread:$0]  (!%p2586_p11), %s2595_s29, 128, %s2629_s26, %s370_s18, %s2844_s15, %s2844_s15, %s2843_s7  }
  0x76   : > { %392 = sbr.rel (%p2509_p8) target bundleno = 849 (0x351), region = 60  ;;  %s2659_s0 = sand.u32 (!%p2509_p8), 1, %s2392_s14  }
  0x77   : > { %s1728_s13 = sshll.u32 (!%p2509_p8), %s2659_s0, 3  ;;  %s395_s20 = scalar_lea.sflag (!%p2509_p8), [#allocation3], %s2659_s0 }
  0x78   : > { %s2663_s23 = scalar_lea.vmem (!%p2509_p8), [#allocation2], %s1728_s13  ;;  %p2845_p5 = scmp.ne.s32.totalorder (!%p2509_p8), %s2830_s19, 0 }
  0x7b   : > { %2367 = dma.done.wait (%p2845_p5), %s395_s20, 128  }
  0x7c   : > { %2369 = vsyncadd (%p2845_p5), %s395_s20, 4294967168  ;;  %s403_s11 = sand.u32 1, %s2490_s17   ;;  %s2670_s29 = scalar_lea.vmem [#allocation5], %s1728_s13 }
  0x7d   : > { %s404_s21 = scalar_lea.sflag [#allocation6], %s403_s11 }
  0x7e   : > { %2371 = dma.done.wait (%p2845_p5), %s404_s21, 128  }
  0x7f   : > { %2373 = vsyncadd (%p2845_p5), %s404_s21, 4294967168  ;;  %p2846_p8 = scmp.eq.s32.totalorder %s2490_s17, 0 }
  0x81   : > { %2375 = dma.done.wait (%p2846_p8), [#allocation6], 2048   ;;  %p2847_p11 = pmov %p2846_p8 }
  0x82   : > { %p2848_p3 = pmov %p2846_p8 }
  0x83   : > { %2377 = vsyncadd (%p2847_p11), [#allocation6], 4294965248 }
  0x84   : > { %2379 = dma.done.wait (%p2848_p3), [#allocation9], 9216   ;;  %p2849_p12 = pmov %p2848_p3 }
  0x85   : > { %v2409_v0 = vmov 0.0   ;;  %vm2410_vm0 = vmmov 0   ;;  %v2100_v1 = vld [vmem:[#allocation7 + $0x38] sm:$0xff]   ;;  %v2102_v3 = vld [vmem:[#allocation7 + $0x30] sm:$0xff]   ;;  %v2104_v5 = vld [vmem:[#allocation7 + $0x28] sm:$0xff]   ;;  %vm726_vm1 = vcmask 1040384   ;;  %v681_v60 = vlaneseq }
  0x86   : > { %2381 = vsyncadd (%p2849_p12), [#allocation9], 4294958080  ;;  %1952 = vmatprep.subr.bf16.mxu0 %v2409_v0  ;;  %1972 = vmatprep.subr.bf16.mxu1 %v2409_v0  ;;  %v2101_v2 = vld [vmem:[#allocation7 + $0x78] sm:$0xff]   ;;  %v2103_v4 = vld [vmem:[#allocation7 + $0x70] sm:$0xff]   ;;  %vm727_vm2 = vsmask.f32 256 }
  0x87   : > { %1968 = vmatprep.mubr.msk.bf16.mxu0 %vm2410_vm0, %v2409_v0  ;;  %1988 = vmatprep.mubr.msk.bf16.mxu1 %vm2410_vm0, %v2409_v0  ;;  %v2105_v6 = vld [vmem:[#allocation7 + $0x68] sm:$0xff]   ;;  %v2106_v7 = vld [vmem:[#allocation7 + $0x20] sm:$0xff]   ;;  %v2108_v9 = vld [vmem:[#allocation7 + $0x18] sm:$0xff]   ;;  %v682_v61 = vshrl.u32 %v681_v60, 7  ;;  %vm737_vm6 = vcmask 1047552   ;;  %s1733_s28 = sshll.u32 %s2659_s0, 4 }
  0x88   : > { %1953 = vmatpush3.bf16.msra.mxu0 %v2100_v1  ;;  %1973 = vmatpush3.bf16.msra.mxu1 %v2101_v2  ;;  %v2107_v8 = vld [vmem:[#allocation7 + $0x60] sm:$0xff]   ;;  %v2109_v10 = vld [vmem:[#allocation7 + $0x58] sm:$0xff]   ;;  %v2110_v11 = vld [vmem:[#allocation7 + $0x10] sm:$0xff]   ;;  %vm738_vm7 = vsmask.f32 7424  ;;  %s1836_s24 = sshll.u32 %s2490_s17, 8 }
  0x89   : > { %1954 = vmatprep.subr.bf16.mxu0 %v2409_v0  ;;  %1974 = vmatprep.subr.bf16.mxu1 %v2409_v0  ;;  %v2111_v12 = vld [vmem:[#allocation7 + $0x50] sm:$0xff]   ;;  %v2112_v13 = vld [vmem:[#allocation7 + $0x8] sm:$0xff]   ;;  %v2114_v15 = vld [vmem:[#allocation7] sm:$0xff]   ;;  %v683_v62 = vadd.s32 8, %v682_v61  ;;  %v684_v63 = vand.u32 1, %v682_v61  ;;  %s460_s12 = scalar_lea.vmem [#allocation11], %s1733_s28  ;;  %s2756_s11 = scalar_lea.hbm %s2811_s10, %s1836_s24 }
  0x8a   : > { %v2113_v14 = vld [vmem:[#allocation7 + $0x48] sm:$0xff]   ;;  %v2115_v16 = vld [vmem:[#allocation7 + $0x40] sm:$0xff]   ;;  %v2121_v18 = vld [vmem:[#allocation8 + $0x78] sm:$0xff]   ;;  %s1591_s13 = sshll.u32 %s460_s12, 4  ;;  %s1578_s21 = scalar_lea.sflag [#allocation4], %s2659_s0  ;;  %s2758_s13 = int_to_ptr.vmem [resolvable:$true] %s1591_s13 }
  0x8b   : > { %v2116_v17 = vld [vmem:[%s2663_s23] sm:$0xff]   ;;  %v2117_v19 = vld [vmem:[#allocation8 + $0xf8] sm:$0xff]   ;;  %v2125_v22 = vld [vmem:[#allocation8 + $0x70] sm:$0xff]   ;;  %v685_v1 = vand.u32 1, %v683_v62  ;;  %vm686_vm4 = vcmp.eq.s32.totalorder %v684_v63, 0  ;;  %p2854_p13 = scmp.ne.s32.totalorder %s2840_s25, 0 }
  0x8c   : > { %1955 = vmatpush3.bf16.msra.mxu0 %v2102_v3  ;;  %1975 = vmatpush3.bf16.msra.mxu1 %v2103_v4  ;;  %v2118_v20 = vld [vmem:[#allocation8 + $0xb8] sm:$0xff]   ;;  %v2119_v23 = vld [vmem:[#allocation8 + $0xf0] sm:$0xff]   ;;  %v2123_v25 = vld [vmem:[#allocation8 + $0xe8] sm:$0xff]   ;;  %s2411_s17 = smov [#allocation11]  }
  0x8d   : > { %1956 = vmatprep.subr.bf16.mxu0 %v2409_v0  ;;  %1976 = vmatprep.subr.bf16.mxu1 %v2409_v0  ;;  %v2122_v21 = vld [vmem:[#allocation8 + $0x38] sm:$0xff]   ;;  %v2120_v24 = vld [vmem:[#allocation8 + $0xb0] sm:$0xff]   ;;  %v2129_v27 = vld [vmem:[#allocation8 + $0x68] sm:$0xff]   ;;  %vm687_vm5 = vcmp.eq.s32.totalorder %v685_v1, 0  ;;  %s2328_s19 = sshll.u32 %s2411_s17, 4  ;;  %s2329_s19 = int_to_ptr.vmem [resolvable:$false] %s2328_s19 }
  0x8e   : > { %v2126_v26 = vld [vmem:[#allocation8 + $0x30] sm:$0xff]   ;;  %v2130_v28 = vld [vmem:[#allocation8 + $0x28] sm:$0xff]   ;;  %v2133_v30 = vld [vmem:[#allocation8 + $0x60] sm:$0xff]   ;;  %s2330_s7 = scalar_lea.vmem %s2329_s19, 512  ;;  %p2331_p10 = scmp.lt.s32.totalorder %s2758_s13, %s2329_s19 }
  0x8f   : > { %v2124_v29 = vld [vmem:[#allocation8 + $0xa8] sm:$0xff]   ;;  %v2127_v31 = vld [vmem:[#allocation8 + $0xe0] sm:$0xff]   ;;  %v2131_v34 = vld [vmem:[#allocation8 + $0xd8] sm:$0xff]  }
  0x90   : > { %1957 = vmatpush3.bf16.msra.mxu0 %v2104_v5  ;;  %1977 = vmatpush3.bf16.msra.mxu1 %v2105_v6  ;;  %v2134_v32 = vld [vmem:[#allocation8 + $0x20] sm:$0xff]   ;;  %v2132_v35 = vld [vmem:[#allocation8 + $0x98] sm:$0xff]   ;;  %v2135_v36 = vld [vmem:[#allocation8 + $0xd0] sm:$0xff]  }
  0x91   : > { %1958 = vmatprep.subr.bf16.mxu0 %v2409_v0  ;;  %1978 = vmatprep.subr.bf16.mxu1 %v2409_v0  ;;  %v2128_v33 = vld [vmem:[#allocation8 + $0xa0] sm:$0xff]   ;;  %v2136_v37 = vld [vmem:[#allocation8 + $0x90] sm:$0xff]   ;;  %v2137_v38 = vld [vmem:[#allocation8 + $0x58] sm:$0xff]  }
  0x92   : > { %v2138_v39 = vld [vmem:[#allocation8 + $0x18] sm:$0xff]   ;;  %v2139_v40 = vld [vmem:[#allocation8 + $0xc8] sm:$0xff]   ;;  %v2141_v42 = vld [vmem:[#allocation8 + $0x50] sm:$0xff]  }
  0x93   : > { %v2140_v41 = vld [vmem:[#allocation8 + $0x88] sm:$0xff]   ;;  %v2142_v43 = vld [vmem:[#allocation8 + $0x10] sm:$0xff]   ;;  %v2143_v44 = vld [vmem:[#allocation8 + $0xc0] sm:$0xff]  }
  0x94   : > { %1959 = vmatpush3.bf16.msra.mxu0 %v2106_v7  ;;  %1979 = vmatpush3.bf16.msra.mxu1 %v2107_v8  ;;  %v2144_v45 = vld [vmem:[#allocation8 + $0x80] sm:$0xff]   ;;  %v2145_v46 = vld [vmem:[#allocation8 + $0x48] sm:$0xff]   ;;  %v2147_v48 = vld [vmem:[%s2670_s29] sm:$0xff]   ;;  %s2324_s29 = scalar_lea.vmem %s2758_s13, 256 }
  0x95   : > { %1960 = vmatprep.subr.bf16.mxu0 %v2409_v0  ;;  %1980 = vmatprep.subr.bf16.mxu1 %v2409_v0  ;;  %v2146_v47 = vld [vmem:[#allocation8 + $0x8] sm:$0xff]   ;;  %v718_v49 = vshrl.u32 %v2147_v48, 16  ;;  %v2148_v50 = vld [vmem:[#allocation8 + $0x40] sm:$0xff]   ;;  %v721_v52 = vshll.u32 %v2147_v48, 16  ;;  %v2150_v54 = vld [vmem:[#allocation8 + $0x178] sm:$0xff]   ;;  %p2325_p9 = scmp.ne.s32.totalorder %s2758_s13, %s2324_s29  ;;  %p2332_p1 = scmp.lt.s32.totalorder %s2330_s7, %s2324_s29 }
  0x96   : > { %v2149_v51 = vld [vmem:[#allocation8] sm:$0xff]   ;;  %vm2706_vm3 = vmand %vm726_vm1, %vm727_vm2  ;;  %v2184_v60 = vld [vmem:[#allocation10 + $0x48] sm:$0xff]  }
  0x97   : > { %v720_v53 = vrot.slane %v718_v49, 7  ;;  %v733_v58 = vrot.slane %v721_v52, 1  ;;  %v1751_v7 = vld [vmem:[%s2804_s3] ss:$0 sm:$0xff]  ;;  %vm2715_vm8 = vmand %vm737_vm6, %vm738_vm7  ;;  %v2185_v61 = vld [vmem:[#allocation10 + $0x8] sm:$0xff]   ;;  %p2326_p0 = pnand %p2325_p9, %p2854_p13  ;;  %p2333_p4 = por %p2332_p1, %p2331_p10 }
  0x98   : > { %1961 = vmatpush3.bf16.msra.mxu0 %v2108_v9  ;;  %1981 = vmatpush3.bf16.msra.mxu1 %v2109_v10  ;;  %v2186_v62 = vld [vmem:[#allocation10 + $0x88] sm:$0xff]   ;;  %v2187_v63 = vld [vmem:[#allocation10 + $0x40] sm:$0xff]  }
  0x99   : > { %1962 = vmatprep.subr.bf16.mxu0 %v2409_v0  ;;  %1982 = vmatprep.subr.bf16.mxu1 %v2409_v0  ;;  %v723_v56 = vor.u32 %v721_v52, %v720_v53  ;;  %v734_v59 = vor.u32 %v733_v58, %v718_v49  ;;  %v2174_v49 = vld [vmem:[#allocation10 + $0xa8] sm:$0xff]   ;;  %v2177_v52 = vld [vmem:[#allocation10 + $0xa0] sm:$0xff]   ;;  %v2178_v53 = vld [vmem:[#allocation10 + $0x58] sm:$0xff]   ;;  %p2327_p2 = pneg %p2326_p0 }
  0x9a   : > { %v2182_v58 = vld [vmem:[#allocation10 + $0x10] sm:$0xff]   ;;  %v2188_v1 = vld [vmem:[#allocation10] sm:$0xff]  }
  0x9b   : > { %v730_v57 = vsel %vm2706_vm3, 0, %v723_v56  ;;  %v2180_v56 = vld [vmem:[#allocation10 + $0x98] sm:$0xff]   ;;  %p2334_p6 = pnand %p2333_p4, %p2327_p2 }
  0x9c   : > { %1963 = vmatpush3.bf16.msra.mxu0 %v2110_v11  ;;  %1983 = vmatpush3.bf16.msra.mxu1 %v2111_v12 }
  0x9d   : > { %1964 = vmatprep.subr.bf16.mxu0 %v2409_v0  ;;  %1984 = vmatprep.subr.bf16.mxu1 %v2409_v0 }
  0xa0   : > { %1965 = vmatpush3.bf16.msra.mxu0 %v2112_v13  ;;  %1985 = vmatpush3.bf16.msra.mxu1 %v2113_v14 }
  0xa1   : > { %1966 = vmatprep.subr.bf16.mxu0 %v2409_v0  ;;  %1986 = vmatprep.subr.bf16.mxu1 %v2409_v0 }
  0xa4   : > { %1967 = vmatpush3.bf16.msra.mxu0 %v2114_v15  ;;  %1987 = vmatpush3.bf16.msra.mxu1 %v2115_v16 }
  0xa5   : > { %1855 = vmatprep.subr.bf16.mxu0 %v2121_v18  ;;  %1877 = vmatprep.subr.bf16.mxu1 %v2117_v19 }
  0xa7   : > { %1969 = vmatmul.mubr.bf16.vlgmr.msra.gmra.mxu0 %v2116_v17  ;;  %1989 = vmatmul.mubr.bf16.vlgmr.msra.gmra.mxu1 %v2116_v17 }
  0xa8   : > { %1856 = vmatpush3.bf16.msra.mxu0 %v2122_v21  ;;  %1878 = vmatpush3.bf16.msra.mxu1 %v2118_v20  ;;  %v2151_v20 = vld [vmem:[#allocation8 + $0x138] sm:$0xff]   ;;  %v1828_v21 = vld [vmem:[%s2810_s9] ss:$0 sm:$0xff] }
  0xa9   : > { %1857 = vmatprep.subr.bf16.mxu0 %v2125_v22  ;;  %1879 = vmatprep.subr.bf16.mxu1 %v2119_v23  ;;  %v2152_v22 = vld [vmem:[#allocation8 + $0x170] sm:$0xff]   ;;  %v741_v23 = vsel %vm2715_vm8, %v734_v59, 0 }
  0xaa   : > { %1199 = vmatprep.mubr.bf16.mxu1 %v2147_v48  ;;  %1158 = vmatprep.mubr.bf16.mxu0 %v730_v57  ;;  %v2173_v48 = vld [vmem:[#allocation10 + $0x28] sm:$0xff]   ;;  %v2181_v57 = vld [vmem:[#allocation10 + $0x50] sm:$0xff]  }
  0xab   : > { %v2183_v59 = vld [vmem:[#allocation10 + $0x90] sm:$0xff]  }
  0xac   : > { %1858 = vmatpush3.bf16.msra.mxu0 %v2126_v26  ;;  %1880 = vmatpush3.bf16.msra.mxu1 %v2120_v24  ;;  %v2154_v26 = vld [vmem:[#allocation8 + $0x168] sm:$0xff]  }
  0xad   : > { %1859 = vmatprep.subr.bf16.mxu0 %v2129_v27  ;;  %1881 = vmatprep.subr.bf16.mxu1 %v2123_v25  ;;  %v2153_v25 = vld [vmem:[#allocation8 + $0x130] sm:$0xff]   ;;  %v2155_v27 = vld [vmem:[#allocation8 + $0x128] sm:$0xff]  }
  0xb0   : > { %1860 = vmatpush3.bf16.msra.mxu0 %v2130_v28  ;;  %1882 = vmatpush3.bf16.msra.mxu1 %v2124_v29  ;;  %v2156_v28 = vld [vmem:[#allocation8 + $0x160] sm:$0xff]  }
  0xb1   : > { %1861 = vmatprep.subr.bf16.mxu0 %v2133_v30  ;;  %1883 = vmatprep.subr.bf16.mxu1 %v2127_v31  ;;  %v2157_v29 = vld [vmem:[#allocation8 + $0x120] sm:$0xff]   ;;  %v2158_v30 = vld [vmem:[#allocation8 + $0x158] sm:$0xff]  }
  0xb2   : > { %v2159_v31 = vld [vmem:[#allocation8 + $0x118] sm:$0xff]  }
  0xb4   : > { %1862 = vmatpush3.bf16.msra.mxu0 %v2134_v32  ;;  %1884 = vmatpush3.bf16.msra.mxu1 %v2128_v33  ;;  %v2160_v32 = vld [vmem:[#allocation8 + $0x150] sm:$0xff]  }
  0xb5   : > { %1885 = vmatprep.subr.bf16.mxu1 %v2131_v34  ;;  %1863 = vmatprep.subr.bf16.mxu0 %v2137_v38  ;;  %v2161_v33 = vld [vmem:[#allocation8 + $0x110] sm:$0xff]   ;;  %v2162_v34 = vld [vmem:[#allocation8 + $0x148] sm:$0xff]   ;;  %v2165_v38 = vld [vmem:[#allocation8 + $0x100] sm:$0xff]  }
  0xb8   : > { %1886 = vmatpush3.bf16.msra.mxu1 %v2132_v35  ;;  %1864 = vmatpush3.bf16.msra.mxu0 %v2138_v39  ;;  %v2163_v35 = vld [vmem:[#allocation8 + $0x108] sm:$0xff]  }
  0xb9   : > { %1887 = vmatprep.subr.bf16.mxu1 %v2135_v36  ;;  %1865 = vmatprep.subr.bf16.mxu0 %v2141_v42  ;;  %v2164_v36 = vld [vmem:[#allocation8 + $0x140] sm:$0xff]   ;;  %v2167_v42 = vld [vmem:[#allocation10 + $0x38] sm:$0xff]  }
  0xbc   : > { %1888 = vmatpush3.bf16.msra.mxu1 %v2136_v37  ;;  %1866 = vmatpush3.bf16.msra.mxu0 %v2142_v43  ;;  %v2168_v43 = vld [vmem:[#allocation10 + $0xb8] sm:$0xff]  }
  0xbd   : > { %1889 = vmatprep.subr.bf16.mxu1 %v2139_v40  ;;  %1867 = vmatprep.subr.bf16.mxu0 %v2145_v46  ;;  %v2170_v46 = vld [vmem:[#allocation10 + $0x30] sm:$0xff]  }
  0xc0   : > { %1890 = vmatpush3.bf16.msra.mxu1 %v2140_v41  ;;  %1868 = vmatpush3.bf16.msra.mxu0 %v2146_v47  ;;  %v2166_v41 = vld [vmem:[#allocation10 + $0x78] sm:$0xff]   ;;  %v2172_v47 = vld [vmem:[#allocation10 + $0x68] sm:$0xff]  }
  0xc1   : > { %1891 = vmatprep.subr.bf16.mxu1 %v2143_v44  ;;  %1869 = vmatprep.subr.bf16.mxu0 %v2148_v50  ;;  %v2169_v44 = vld [vmem:[#allocation10 + $0x70] sm:$0xff]   ;;  %v2175_v50 = vld [vmem:[#allocation10 + $0x60] sm:$0xff]  }
  0xc4   : > { %1892 = vmatpush3.bf16.msra.mxu1 %v2144_v45  ;;  %1870 = vmatpush3.bf16.msra.mxu0 %v2149_v51  ;;  %v2171_v45 = vld [vmem:[#allocation10 + $0xb0] sm:$0xff]   ;;  %v2176_v51 = vld [vmem:[#allocation10 + $0x20] sm:$0xff]  }
  0xc5   : > { %1899 = vmatprep.subr.bf16.mxu0 %v2150_v54  ;;  %1921 = vmatprep.subr.bf16.mxu1 %v2166_v41  ;;  %v2179_v54 = vld [vmem:[#allocation10 + $0x18] sm:$0xff]  }
 0x167   : > { %v568_v2 = vpop.f32.mrf.mxu0  ;;  %v674_v3 = vpop.f32.mrf.mxu1 }
 0x168   : > { %v688_v6 = vsel %vm686_vm4, %v568_v2, %v674_v3  ;;  %v2189_v2 = vld [vmem:[#allocation10 + $0x80] sm:$0xff]  }
 0x169   : > { %v1970_v4 = vpop.f32.mrf.mxu0  ;;  %v1990_v5 = vpop.f32.mrf.mxu1  ;;  %v697_v12 = vadd.f32 %v1751_v7, %v688_v6 }
 0x16b   : > { %v571_v8 = vpop.f32.mrf.mxu0  ;;  %v677_v9 = vpop.f32.mrf.mxu1 }
 0x16c   : > { %v689_v10 = vsel %vm687_vm5, %v571_v8, %v677_v9 }
 0x16d   : > { %v1971_v11 = vpop.f32.mrf.mxu0  ;;  %v698_v13 = vadd.f32 %v1751_v7, %v689_v10  ;;  %v1991_v14 = vpop.f32.mrf.mxu1 }
 0x16f   : > { %v699_v15 = vpack.c.bf16 %v698_v13, %v697_v12 }
 0x171   : > { %v711_v16 = vshrl.u32 %v699_v15, 16  ;;  %1200 = vmatmul.mubr.bf16.vlgmr.msra.gmra.mxu1 %v699_v15  ;;  %v714_v18 = vshll.u32 %v699_v15, 16 }
 0x172   : > { %1922 = vmatpush3.bf16.msra.mxu1 %v2167_v42 }
 0x173   : > { %v713_v17 = vrot.slane %v711_v16, 7  ;;  %v731_v37 = vrot.slane %v714_v18, 1  ;;  %1923 = vmatprep.subr.bf16.mxu1 %v2169_v44 }
 0x175   : > { %v716_v19 = vor.u32 %v714_v18, %v713_v17  ;;  %v732_v39 = vor.u32 %v731_v37, %v711_v16 }
 0x176   : > { %1924 = vmatpush3.bf16.msra.mxu1 %v2170_v46 }
 0x177   : > { %v729_v24 = vsel %vm2706_vm3, 0, %v716_v19  ;;  %v740_v40 = vsel %vm2715_vm8, %v732_v39, 0  ;;  %1925 = vmatprep.subr.bf16.mxu1 %v2172_v47  ;;  %v1827_v47 = vld [vmem:[%s2809_s8] ss:$0 sm:$0xff] }
 0x178   : > { %1159 = vmatmul.mubr.bf16.vlgmr.msra.gmra.mxu0 %v729_v24 }
 0x179   : > { %1900 = vmatpush3.bf16.msra.mxu0 %v2151_v20  ;;  %1240 = vmatprep.mubr.bf16.mxu0 %v741_v23 }
 0x17a   : > { %1901 = vmatprep.subr.bf16.mxu0 %v2152_v22  ;;  %1926 = vmatpush3.bf16.msra.mxu1 %v2173_v48 }
 0x17b   : > { %1927 = vmatprep.subr.bf16.mxu1 %v2175_v50 }
 0x17d   : > { %1902 = vmatpush3.bf16.msra.mxu0 %v2153_v25 }
 0x17e   : > { %1903 = vmatprep.subr.bf16.mxu0 %v2154_v26  ;;  %1928 = vmatpush3.bf16.msra.mxu1 %v2176_v51  ;;  %v1802_v26 = vld [vmem:[%s2807_s6] ss:$0 sm:$0xff] }
 0x17f   : > { %1929 = vmatprep.subr.bf16.mxu1 %v2178_v53 }
 0x181   : > { %1904 = vmatpush3.bf16.msra.mxu0 %v2155_v27 }
 0x182   : > { %1905 = vmatprep.subr.bf16.mxu0 %v2156_v28  ;;  %1930 = vmatpush3.bf16.msra.mxu1 %v2179_v54 }
 0x183   : > { %1931 = vmatprep.subr.bf16.mxu1 %v2181_v57 }
 0x185   : > { %1906 = vmatpush3.bf16.msra.mxu0 %v2157_v29 }
 0x186   : > { %1907 = vmatprep.subr.bf16.mxu0 %v2158_v30  ;;  %1932 = vmatpush3.bf16.msra.mxu1 %v2182_v58 }
 0x187   : > { %1933 = vmatprep.subr.bf16.mxu1 %v2184_v60 }
 0x189   : > { %1908 = vmatpush3.bf16.msra.mxu0 %v2159_v31 }
 0x18a   : > { %1909 = vmatprep.subr.bf16.mxu0 %v2160_v32  ;;  %1934 = vmatpush3.bf16.msra.mxu1 %v2185_v61 }
 0x18b   : > { %1935 = vmatprep.subr.bf16.mxu1 %v2187_v63 }
 0x18d   : > { %1910 = vmatpush3.bf16.msra.mxu0 %v2161_v33 }
 0x18e   : > { %1911 = vmatprep.subr.bf16.mxu0 %v2162_v34  ;;  %1936 = vmatpush3.bf16.msra.mxu1 %v2188_v1 }
 0x191   : > { %1912 = vmatpush3.bf16.msra.mxu0 %v2163_v35 }
 0x192   : > { %1913 = vmatprep.subr.bf16.mxu0 %v2164_v36 }
 0x195   : > { %1914 = vmatpush3.bf16.msra.mxu0 %v2165_v38 }
 0x196   : > { %1992 = vmatprep.subr.bf16.mxu0 %v2409_v0 }
 0x198   : > { %1241 = vmatmul.mubr.bf16.vlgmr.msra.gmra.mxu0 %v740_v40 }
 0x199   : > { %2008 = vmatprep.mubr.msk.bf16.mxu0 %vm2410_vm0, %v2409_v0  ;;  %1993 = vmatpush3.bf16.msra.mxu0 %v2168_v43 }
 0x19a   : > { %1994 = vmatprep.subr.bf16.mxu0 %v2409_v0 }
 0x19d   : > { %1995 = vmatpush3.bf16.msra.mxu0 %v2171_v45 }
 0x19e   : > { %1996 = vmatprep.subr.bf16.mxu0 %v2409_v0 }
 0x1a1   : > { %1997 = vmatpush3.bf16.msra.mxu0 %v2174_v49 }
 0x1a2   : > { %1998 = vmatprep.subr.bf16.mxu0 %v2409_v0 }
 0x1a5   : > { %1999 = vmatpush3.bf16.msra.mxu0 %v2177_v52 }
 0x1a6   : > { %2000 = vmatprep.subr.bf16.mxu0 %v2409_v0 }
 0x1a9   : > { %2001 = vmatpush3.bf16.msra.mxu0 %v2180_v56 }
 0x1aa   : > { %2002 = vmatprep.subr.bf16.mxu0 %v2409_v0 }
 0x1ad   : > { %2003 = vmatpush3.bf16.msra.mxu0 %v2183_v59 }
 0x1ae   : > { %2004 = vmatprep.subr.bf16.mxu0 %v2409_v0 }
 0x1b1   : > { %2005 = vmatpush3.bf16.msra.mxu0 %v2186_v62 }
 0x1b2   : > { %2006 = vmatprep.subr.bf16.mxu0 %v2409_v0  ;;  %v1801_v0 = vld [vmem:[%s2806_s5] ss:$0 sm:$0xff] }
 0x1b5   : > { %2007 = vmatpush3.bf16.msra.mxu0 %v2189_v2 }
 0x231   : > { %v1893_v4 = vpop.f32.mrf.mxu1 }
 0x233   : > { %v1894_v6 = vpop.f32.mrf.mxu1 }
 0x234   : > { %v1895_v12 = vadd.f32 %v1894_v6, %v1893_v4 }
 0x235   : > { %v1896_v8 = vpop.f32.mrf.mxu1 }
 0x237   : > { %v1897_v13 = vpop.f32.mrf.mxu1 }
 0x238   : > { %v1871_v3 = vpop.f32.mrf.mxu0  ;;  %v1898_v19 = vadd.f32 %v1897_v13, %v1896_v8 }
 0x23a   : > { %v1872_v5 = vpop.f32.mrf.mxu0 }
 0x23b   : > { %v1873_v10 = vadd.f32 %v1872_v5, %v1871_v3 }
 0x23c   : > { %v1874_v7 = vpop.f32.mrf.mxu0 }
 0x23d   : > { %v1202_v15 = vadd.f32 %v1895_v12, %v1873_v10 }
 0x23e   : > { %v1875_v9 = vpop.f32.mrf.mxu0 }
 0x23f   : > { %v1876_v16 = vadd.f32 %v1875_v9, %v1874_v7 }
 0x241   : > { %v1205_v23 = vadd.f32 %v1898_v19, %v1876_v16 }
 0x258   : > { %v1915_v11 = vpop.f32.mrf.mxu0 }
 0x25a   : > { %v1916_v14 = vpop.f32.mrf.mxu0 }
 0x25b   : > { %v1917_v17 = vadd.f32 %v1916_v14, %v1915_v11 }
 0x25c   : > { %v1918_v18 = vpop.f32.mrf.mxu0 }
 0x25d   : > { %v1243_v20 = vadd.f32 %v1917_v17, %v1202_v15 }
 0x25e   : > { %v1919_v22 = vpop.f32.mrf.mxu0 }
 0x25f   : > { %v1255_v24 = vmul.f32 %v1801_v0, %v1243_v20  ;;  %v1920_v25 = vadd.f32 %v1919_v22, %v1918_v18 }
 0x261   : > { %v1246_v27 = vadd.f32 %v1920_v25, %v1205_v23  ;;  %v1263_v29 = vadd.f32 %v1802_v26, %v1255_v24 }
 0x263   : > { %v1256_v28 = vmul.f32 %v1801_v0, %v1246_v27  ;;  %v1265_v31 = vmax.f32 %v1263_v29, 0.0 }
 0x265   : > { %v1264_v30 = vadd.f32 %v1802_v26, %v1256_v28 }
 0x267   : > { %v1266_v32 = vmax.f32 %v1264_v30, 0.0 }
 0x269   : > { %v1267_v33 = vpack.c.bf16 %v1266_v32, %v1265_v31 }
 0x26b   : > { %v1271_v34 = vshrl.u32 %v1267_v33, 16  ;;  %1507 = vmatprep.mubr.bf16.mxu1 %v1267_v33  ;;  %v1274_v35 = vshll.u32 %v1267_v33, 16 }
 0x26d   : > { %v1273_v36 = vrot.slane %v1271_v34, 7  ;;  %v1279_v37 = vrot.slane %v1274_v35, 1 }
 0x26f   : > { %v1276_v38 = vor.u32 %v1274_v35, %v1273_v36  ;;  %v1280_v39 = vor.u32 %v1279_v37, %v1271_v34 }
 0x271   : > { %v1278_v40 = vsel %vm2706_vm3, 0, %v1276_v38  ;;  %v1282_v41 = vsel %vm2715_vm8, %v1280_v39, 0 }
 0x272   : > { %1508 = vmatmul.mubr.bf16.vlgmr.msra.gmra.mxu1 %v1278_v40  ;;  %2009 = vmatmul.mubr.bf16.vlgmr.msra.gmra.mxu0 %v1282_v41 }
 0x332   : > { %v1937_v42 = vpop.f32.mrf.mxu1  ;;  %v1550_v43 = vpop.f32.mrf.mxu0 }
 0x334   : > { %v1938_v44 = vpop.f32.mrf.mxu1  ;;  %v2010_v45 = vpop.f32.mrf.mxu0 }
 0x335   : > { %v1939_v46 = vadd.f32 %v1938_v44, %v1937_v42 }
 0x336   : > { %v1940_v48 = vpop.f32.mrf.mxu1  ;;  %v1553_v49 = vpop.f32.mrf.mxu0 }
 0x337   : > { %v1551_v55 = vadd.f32 %v1939_v46, %v1550_v43 }
 0x338   : > { %v1941_v50 = vpop.f32.mrf.mxu1  ;;  %v2011_v51 = vpop.f32.mrf.mxu0 }
 0x339   : > { %v1563_v52 = vmul.f32 %v1827_v47, %v1551_v55  ;;  %v1942_v53 = vadd.f32 %v1941_v50, %v1940_v48 }
 0x33b   : > { %v1571_v54 = vadd.f32 %v1828_v21, %v1563_v52  ;;  %v1554_v56 = vadd.f32 %v1942_v53, %v1553_v49 }
 0x33d   : > { %v1573_v57 = vmax.f32 %v1571_v54, 0.0  ;;  %v1564_v58 = vmul.f32 %v1827_v47, %v1554_v56 }
 0x33f   : > { %1575 = vst [vmem:[%s460_s12] sm:$0xff] %v1573_v57  ;;  %v1572_v59 = vadd.f32 %v1828_v21, %v1564_v58 }
 0x341   : > { %v1574_v60 = vmax.f32 %v1572_v59, 0.0 }
 0x343   : > { %1576 = vst [vmem:[%s460_s12 + $0x8] sm:$0xff] %v1574_v60 }
 0x344   : > { %2337 = shalt.err (!%p2334_p6)
}
 0x345   : > { %s2338_s15 = scalar_lea.hbm %s2756_s11, 256  ;;  %s2342_s2 = scalar_lea.hbm %s2811_s10, 512 }
 0x346   : > { %p2339_p7 = scmp.ne.s32.totalorder %s2756_s11, %s2338_s15  ;;  %p2343_p11 = scmp.lt.s32.totalorder %s2756_s11, %s2811_s10 }
 0x347   : > { %p2344_p3 = scmp.lt.s32.totalorder %s2342_s2, %s2338_s15 }
 0x348   : > { %p2340_p5 = pnand %p2339_p7, %p2854_p13 }
 0x349   : > { %p2345_p12 = por %p2344_p3, %p2343_p11 }
 0x34a   : > { %p2341_p8 = pneg %p2340_p5 }
 0x34c   : > { %p2346_p9 = pnand %p2345_p12, %p2341_p8 }
 0x34e   : > { %2349 = shalt.err (!%p2346_p9)
}
 0x34f   : > { %s2412_s27 = smov 128   ;;  %s2413_s30 = smov 8  }
 0x350   : > { %2028 = dma.vmem_to_hbm [thread:$0]  (%p2854_p13), %s2758_s13, 256, %s2756_s11, %s1578_s21, %s2412_s27, %s2412_s27, %s2413_s30  }
 0x351 PF: > { %s2855_s28 = sld [smem:[#allocation17_spill]]  ;;  %p2858_p2 = scmp.ge.s32.totalorder %s2400_s16, 2 }
 0x352   : > { %s2856_s24 = sld [smem:[#allocation19_spill]] }
 0x357   : > { %s1606_s12 = sand.u32 1, %s2855_s28  }
 0x358   : > { %p2857_p0 = scmp.ne.s32.totalorder %s2856_s24, 0  ;;  %s1607_s20 = scalar_lea.sflag [#allocation4], %s1606_s12 }
 0x35a   : > { %p2048_p10 = pnand %p2858_p2, %p2857_p0 }
 0x35c   : > { %p2049_p1 = pneg %p2048_p10 }
 0x35e   : > { %2383 = dma.done.wait (%p2049_p1), %s1607_s20, 256  }
 0x35f   : > { %2385 = vsyncadd (%p2049_p1), %s1607_s20, 4294967040  ;;  %s2859_s16 = sld [smem:[#allocation20_spill]]  ;;  %s2862_s13 = smov %s2392_s14 }
 0x360   : > { %s2860_s23 = sld [smem:[#allocation18_spill]] }
 0x361   : > { %s2861_s15 = sld [smem:[#allocation21_spill]] }
 0x365   : > { %p27_p4 = scmp.ge.s32.totalorder %s2859_s16, 4  }
 0x366   : > { %s2863_s14 = smov %s2860_s23 }
 0x367   :  { %29 = sbr.rel (!%p27_p4) target bundleno = 13 (0xd), region = 131 }
 0x36c   :  { %1612 = vsyncpa [#allocation3], 1 }
 0x36d   :  { %1614 = vsyncpa [#allocation3 + $0x1], 1 }
 0x36e   :  { %1615 = vsyncpa [#allocation6], 1 }
 0x36f   :  { %1617 = vsyncpa [#allocation6 + $0x1], 1 }
 0x370   :  { %1618 = vsyncpa [#allocation9], 1 }
 0x371   :  { %1619 = vsyncpa [#allocation4], 1 }
 0x372   :  { %1621 = vsyncpa [#allocation4 + $0x1], 1 }

</bundles_post_ra>
